<compile_context>
chip_gen: v7x
topology: tpu7x:2x2x1
jax: 0.10.0
libtpu: 0.0.40
codegen_flags: <defaults>
</compile_context>

<pallas_src>
import functools

import jax
import jax.numpy as jnp
from jax.experimental import pallas as pl
from jax.experimental.pallas import tpu as pltpu


# ----------------------------------------------------------------------------
# Weight preprocessing (runs once in the wrapper, tiny tensors)
# ----------------------------------------------------------------------------
def _banded_weights(w_hwio, W):
    """Fold 3x3 HWIO weights into per-dy banded matrices.

    Returns (3, W*Cin, W*Cout) bf16 with
        band[dy, wi*Cin + ci, wo*Cout + co] = w[dy, wi - wo + 1, ci, co]
    when |wi - wo| <= 1, and 0 otherwise (the zeros encode SAME zero padding along W),
    so a conv output row is  y[r] = x[r-1] @ band[0] + x[r] @ band[1] + x[r+1] @ band[2].
    """
    KH, KW, Cin, Cout = w_hwio.shape
    wi = jnp.arange(W)[:, None]                              # input column
    wo = jnp.arange(W)[None, :]                              # output column
    dx = wi - wo + 1                                         # horizontal tap index
    valid = ((dx >= 0) & (dx < KW)).astype(w_hwio.dtype)     # drop out-of-image columns
    band = w_hwio[:, jnp.clip(dx, 0, KW - 1)]                # (3, W, W, Cin, Cout)
    band = band * valid[None, :, :, None, None]
    band = jnp.transpose(band, (0, 1, 3, 2, 4))              # (3, W, Cin, W, Cout)
    return band.reshape(KH, W * Cin, W * Cout).astype(jnp.bfloat16)


# ----------------------------------------------------------------------------
# Pallas kernels
# ----------------------------------------------------------------------------
def _conv3x3_kernel(x_ref, w_ref, *rest, fuse_bn_relu):
    """3x3 SAME conv (bias-free) of one image as 3 banded MXU matmuls.

    x_ref : (1, H, W*Cin)              lane-folded image (f32 stage 1 / bf16 stage 2)
    w_ref : (3, W*Cin, W*Cout) bf16    banded weights (W zero border folded in)
    scale_ref, bias_ref : (1, W*Cin)   (fused stage only) previous-stage BN scale/bias
    y_ref : (1, H, W*Cout) bf16        pre-BN conv output, lane-dense store
    stats_ref : (1, 2, W*Cout) f32     per-image [sum, sumsq] partials per (w, c) lane
    """
    if fuse_bn_relu:
        scale_ref, bias_ref, y_ref, stats_ref = rest
    else:
        y_ref, stats_ref = rest

    H = x_ref.shape[1]
    x = x_ref[0].astype(jnp.float32)                          # (H, W*Cin)

    if fuse_bn_relu:
        # Previous-stage BatchNorm + ReLU applied on the fly (a1 never hits HBM).
        x = jnp.maximum(x * scale_ref[...] + bias_ref[...], 0.0)

    # SAME zero padding along H, handled in-kernel (post-BN domain for the fused
    # stage): shifted copies with a zero border row.  Only 2 rows of extra work.
    zrow = jnp.zeros((1, x.shape[1]), jnp.float32)
    x_up = jnp.concatenate([zrow, x[:H - 1]], axis=0)         # row r -> x[r-1]
    x_dn = jnp.concatenate([x[1:], zrow], axis=0)             # row r -> x[r+1]

    # Three lane-dense MXU matmuls, f32 accumulation; output layout is already the
    # lane-folded (H, W*Cout) store layout -> no reshuffle before the store.
    acc = jnp.dot(x_up.astype(jnp.bfloat16), w_ref[0],
                  preferred_element_type=jnp.float32)
    acc = acc + jnp.dot(x.astype(jnp.bfloat16), w_ref[1],
                        preferred_element_type=jnp.float32)
    acc = acc + jnp.dot(x_dn.astype(jnp.bfloat16), w_ref[2],
                        preferred_element_type=jnp.float32)

    # Train-mode BatchNorm partials straight from the f32 accumulator (no HBM
    # re-read of y); the tiny per-(w,c) -> per-c fold happens in the wrapper.
    ps = jnp.sum(acc, axis=0, keepdims=True)                  # (1, W*Cout)
    pq = jnp.sum(acc * acc, axis=0, keepdims=True)
    stats_ref[...] = jnp.concatenate([ps, pq], axis=0)[None]  # (1, 2, W*Cout)

    y_ref[...] = acc[None].astype(y_ref.dtype)                # lane-dense bf16 store


def _bn_relu_kernel(y_ref, scale_ref, bias_ref, o_ref):
    o_ref[...] = jnp.maximum(
        y_ref[...].astype(jnp.float32) * scale_ref[...] + bias_ref[...], 0.0
    ).astype(o_ref.dtype)


# ----------------------------------------------------------------------------
# pallas_call wrappers
# ----------------------------------------------------------------------------
def _conv3x3_banded(x3, w_band, scale=None, bias=None):
    """3x3 SAME conv over lane-folded input using pre-banded weights.

    x3     : (N, H, W*Cin)           lane-folded activations (f32 or bf16)
    w_band : (3, W*Cin, W*Cout) bf16
    scale/bias : (W*Cin,) optional   fused previous-stage BN+ReLU applied to the input
    Returns (y, stats): y (N, H, W*Cout) bf16 pre-BN conv output,
                        stats (2, W*Cout) f32 = per-(w,c) [sum, sumsq] over (N, H).
    """
    N, H, WCin = x3.shape
    WCout = w_band.shape[2]
    fuse = scale is not None

    in_specs = [pl.BlockSpec((1, H, WCin), lambda n: (n, 0, 0)),
                pl.BlockSpec((3, WCin, WCout), lambda n: (0, 0, 0))]   # resident weights
    args = [x3, w_band]
    if fuse:
        in_specs += [pl.BlockSpec((1, WCin), lambda n: (0, 0)),
                     pl.BlockSpec((1, WCin), lambda n: (0, 0))]
        args += [scale.reshape(1, WCin).astype(jnp.float32),
                 bias.reshape(1, WCin).astype(jnp.float32)]

    y, stats = pl.pallas_call(
        functools.partial(_conv3x3_kernel, fuse_bn_relu=fuse),
        out_shape=(jax.ShapeDtypeStruct((N, H, WCout), jnp.bfloat16),
                   jax.ShapeDtypeStruct((N, 2, WCout), jnp.float32)),
        grid=(N,),
        in_specs=in_specs,
        out_specs=(pl.BlockSpec((1, H, WCout), lambda n: (n, 0, 0)),
                   pl.BlockSpec((1, 2, WCout), lambda n: (n, 0, 0))),
        compiler_params=pltpu.CompilerParams(dimension_semantics=("parallel",)),
    )(*args)
    return y, jnp.sum(stats, axis=0)


def _bn_relu(y3, scale, bias):
    """Lane-dense fused affine-BN + ReLU over (N, H, W*C)."""
    N, H, WC = y3.shape
    return pl.pallas_call(
        _bn_relu_kernel,
        out_shape=jax.ShapeDtypeStruct((N, H, WC), jnp.float32),
        grid=(N,),
        in_specs=[pl.BlockSpec((1, H, WC), lambda n: (n, 0, 0)),
                  pl.BlockSpec((1, WC), lambda n: (0, 0)),
                  pl.BlockSpec((1, WC), lambda n: (0, 0))],
        out_specs=pl.BlockSpec((1, H, WC), lambda n: (n, 0, 0)),
        compiler_params=pltpu.CompilerParams(dimension_semantics=("parallel",)),
    )(y3, scale.reshape(1, WC).astype(jnp.float32),
      bias.reshape(1, WC).astype(jnp.float32))


def double_conv_pallas(x_nchw, w1_hwio, w2_hwio, gamma1, beta1, gamma2, beta2,
                       eps=1e-5):
    N, Cin, H, W = x_nchw.shape
    Cmid = w1_hwio.shape[-1]
    Cout = w2_hwio.shape[-1]
    cnt = N * H * W

    # NCHW -> channels folded into the lane axis: (N, H, W*Cin).  The input is the
    # smallest tensor in the pipeline, so this one small layout pass stays in XLA.
    x3 = jnp.transpose(x_nchw, (0, 2, 3, 1)).reshape(N, H, W * Cin)

    # Fold the 3x3 kernels + W zero border into banded matmul weights (once).
    w1b = _banded_weights(w1_hwio, W)     # (3, W*Cin,  W*Cmid)
    w2b = _banded_weights(w2_hwio, W)     # (3, W*Cmid, W*Cout)

    # Stage 1: conv1 (bf16 output) + per-image [sum, sumsq] partials.
    y1, st1 = _conv3x3_banded(x3, w1b)
    st1 = jnp.sum(st1.reshape(2, W, Cmid), axis=1)            # (2, Cmid)
    m1 = st1[0] / cnt
    v1 = jnp.maximum(st1[1] / cnt - m1 * m1, 0.0)
    sc1 = gamma1 / jnp.sqrt(v1 + eps)
    bi1 = beta1 - m1 * sc1

    # Stage 2: BN1 + ReLU fused into conv2's prologue (a1 never hits HBM).
    y2, st2 = _conv3x3_banded(y1, w2b,
                              scale=jnp.tile(sc1, W), bias=jnp.tile(bi1, W))
    st2 = jnp.sum(st2.reshape(2, W, Cout), axis=1)            # (2, Cout)
    m2 = st2[0] / cnt
    v2 = jnp.maximum(st2[1] / cnt - m2 * m2, 0.0)
    sc2 = gamma2 / jnp.sqrt(v2 + eps)
    bi2 = beta2 - m2 * sc2

    # Final BN2 + ReLU (needs global y2 statistics -> one lane-dense pass).
    out3 = _bn_relu(y2, jnp.tile(sc2, W), jnp.tile(bi2, W))
    return jnp.transpose(out3.reshape(N, H, W, Cout), (0, 3, 1, 2))   # NHWC -> NCHW


# ----------------------------------------------------------------------------
# Pure-JAX reference (mirrors the bf16 matmul operands / f32 accumulation)
# ----------------------------------------------------------------------------
def double_conv_ref(x_nchw, w1, w2, gamma1, beta1, gamma2, beta2, eps=1e-5):
    def conv(x, w):
        return jax.lax.conv_general_dilated(
            x.astype(jnp.bfloat16), w.astype(jnp.bfloat16),
            window_strides=(1, 1), padding="SAME",
            dimension_numbers=("NHWC", "HWIO", "NHWC"),
            preferred_element_type=jnp.float32)

    def bn_relu(y, g, b):
        m = jnp.mean(y, axis=(0, 1, 2))
        v = jnp.mean(y * y, axis=(0, 1, 2)) - m * m
        return jnp.maximum((y - m) / jnp.sqrt(v + eps) * g + b, 0.0)

    x = jnp.transpose(x_nchw, (0, 2, 3, 1))
    a1 = bn_relu(conv(x, w1), gamma1, beta1)
    a2 = bn_relu(conv(a1, w2), gamma2, beta2)
    return jnp.transpose(a2, (0, 3, 1, 2))


# ----------------------------------------------------------------------------
if __name__ == "__main__":
    N, Cin, H, W = 2, 4, 16, 16
    Cmid = 8   # mid_channels defaults to out_channels
    Cout = 8

    key = jax.random.PRNGKey(0)
    kx, kw1, kw2 = jax.random.split(key, 3)

    x = jax.random.normal(kx, (N, Cin, H, W), jnp.float32)
    # PyTorch-shape Conv2d weights expressed in HWIO.
    w1 = jax.random.normal(kw1, (3, 3, Cin, Cmid), jnp.float32) * 0.1
    w2 = jax.random.normal(kw2, (3, 3, Cmid, Cout), jnp.float32) * 0.1
    # BatchNorm2d default init: weight=1, bias=0.
    gamma1 = jnp.ones((Cmid,), jnp.float32)
    beta1 = jnp.zeros((Cmid,), jnp.float32)
    gamma2 = jnp.ones((Cout,), jnp.float32)
    beta2 = jnp.zeros((Cout,), jnp.float32)

    out = jax.jit(double_conv_pallas)(x, w1, w2, gamma1, beta1, gamma2, beta2)
    out = jax.block_until_ready(out)

    ref = double_conv_ref(x, w1, w2, gamma1, beta1, gamma2, beta2)
    assert out.shape == (N, Cout, H, W)
    # bf16 MXU operands (both sides) + bf16 inter-stage storage (kernel side); the
    # bf16 storage error is relative and covered by rtol, the remaining absolute
    # drift on near-zero outputs stays well below atol at these O(1) post-BN scales.
    assert jnp.allclose(out, ref, atol=2e-2, rtol=2e-2), "mismatch vs reference"

    print("KERNEL_OK")
</pallas_src>

<mosaic_0001>
module attributes {stable_mosaic.version = 11 : i64} {
  func.func @_conv3x3_kernel(%arg0: i32, %arg1: memref<1x16x64xf32, #tpu.memory_space<vmem>>, %arg2: memref<3x64x128xbf16, #tpu.memory_space<vmem>>, %arg3: memref<1x16x128xbf16, #tpu.memory_space<vmem>>, %arg4: memref<1x2x128xf32, #tpu.memory_space<vmem>>) attributes {dimension_semantics = [#tpu.dimension_semantics<parallel>], iteration_bounds = array<i64: 2>, scalar_prefetch = 0 : i64, scratch_operands = 0 : i64, tpu.core_type = #tpu.core_type<tc>, window_params = [{transform_indices = @transform_0, window_bounds = array<i64: 1, 16, 64>}, {pipeline_mode = #tpu.pipeline_mode<synchronous>, transform_indices = @transform_1, window_bounds = array<i64: 3, 64, 128>}, {transform_indices = @transform_2, window_bounds = array<i64: 1, 16, 128>}, {transform_indices = @transform_3, window_bounds = array<i64: 1, 2, 128>}]} {
    %c0 = arith.constant 0 : index
    %c0_0 = arith.constant 0 : index
    %c0_1 = arith.constant 0 : index
    %0 = vector.load %arg1[%c0, %c0_0, %c0_1] : memref<1x16x64xf32, #tpu.memory_space<vmem>>, vector<1x16x64xf32>
    %1 = vector.shape_cast %0 : vector<1x16x64xf32> to vector<16x64xf32>
    %cst = arith.constant 0.000000e+00 : f32
    %2 = vector.broadcast %cst : f32 to vector<1x64xf32>
    %3 = vector.extract_strided_slice %1 {offsets = [0, 0], sizes = [15, 64], strides = [1, 1]} : vector<16x64xf32> to vector<15x64xf32>
    %4 = tpu.concatenate %2, %3 in 0 : vector<1x64xf32>, vector<15x64xf32> -> vector<16x64xf32>
    %5 = vector.extract_strided_slice %1 {offsets = [1, 0], sizes = [15, 64], strides = [1, 1]} : vector<16x64xf32> to vector<15x64xf32>
    %6 = tpu.concatenate %5, %2 in 0 : vector<15x64xf32>, vector<1x64xf32> -> vector<16x64xf32>
    %7 = arith.truncf %4 : vector<16x64xf32> to vector<16x64xbf16>
    %c0_2 = arith.constant 0 : index
    %c0_3 = arith.constant 0 : index
    %c0_4 = arith.constant 0 : index
    %8 = vector.load %arg2[%c0_2, %c0_3, %c0_4] : memref<3x64x128xbf16, #tpu.memory_space<vmem>>, vector<1x64x128xbf16>
    %9 = vector.shape_cast %8 : vector<1x64x128xbf16> to vector<64x128xbf16>
    %cst_5 = arith.constant dense<0.000000e+00> : vector<16x128xf32>
    %10 = tpu.matmul %7, %9, %cst_5 {dimension_numbers = #tpu.dot_dimension_numbers<[1], [0], [0], [1], [0, 0, 1, 1], [], []>} : vector<16x64xbf16>, vector<64x128xbf16>, vector<16x128xf32> -> vector<16x128xf32>
    %11 = arith.truncf %1 : vector<16x64xf32> to vector<16x64xbf16>
    %c1 = arith.constant 1 : index
    %c0_6 = arith.constant 0 : index
    %c0_7 = arith.constant 0 : index
    %12 = vector.load %arg2[%c1, %c0_6, %c0_7] : memref<3x64x128xbf16, #tpu.memory_space<vmem>>, vector<1x64x128xbf16>
    %13 = vector.shape_cast %12 : vector<1x64x128xbf16> to vector<64x128xbf16>
    %cst_8 = arith.constant dense<0.000000e+00> : vector<16x128xf32>
    %14 = tpu.matmul %11, %13, %cst_8 {dimension_numbers = #tpu.dot_dimension_numbers<[1], [0], [0], [1], [0, 0, 1, 1], [], []>} : vector<16x64xbf16>, vector<64x128xbf16>, vector<16x128xf32> -> vector<16x128xf32>
    %15 = arith.addf %10, %14 : vector<16x128xf32>
    %16 = arith.truncf %6 : vector<16x64xf32> to vector<16x64xbf16>
    %c2 = arith.constant 2 : index
    %c0_9 = arith.constant 0 : index
    %c0_10 = arith.constant 0 : index
    %17 = vector.load %arg2[%c2, %c0_9, %c0_10] : memref<3x64x128xbf16, #tpu.memory_space<vmem>>, vector<1x64x128xbf16>
    %18 = vector.shape_cast %17 : vector<1x64x128xbf16> to vector<64x128xbf16>
    %cst_11 = arith.constant dense<0.000000e+00> : vector<16x128xf32>
    %19 = tpu.matmul %16, %18, %cst_11 {dimension_numbers = #tpu.dot_dimension_numbers<[1], [0], [0], [1], [0, 0, 1, 1], [], []>} : vector<16x64xbf16>, vector<64x128xbf16>, vector<16x128xf32> -> vector<16x128xf32>
    %20 = arith.addf %15, %19 : vector<16x128xf32>
    %cst_12 = arith.constant dense<0.000000e+00> : vector<128xf32>
    %21 = vector.multi_reduction <add>, %20, %cst_12 [0] : vector<16x128xf32> to vector<128xf32>
    %22 = vector.shape_cast %21 : vector<128xf32> to vector<1x128xf32>
    %23 = arith.mulf %20, %20 : vector<16x128xf32>
    %cst_13 = arith.constant dense<0.000000e+00> : vector<128xf32>
    %24 = vector.multi_reduction <add>, %23, %cst_13 [0] : vector<16x128xf32> to vector<128xf32>
    %25 = vector.shape_cast %24 : vector<128xf32> to vector<1x128xf32>
    %26 = tpu.concatenate %22, %25 in 0 : vector<1x128xf32>, vector<1x128xf32> -> vector<2x128xf32>
    %27 = vector.shape_cast %26 : vector<2x128xf32> to vector<1x2x128xf32>
    %c0_14 = arith.constant 0 : index
    %c0_15 = arith.constant 0 : index
    %c0_16 = arith.constant 0 : index
    %28 = vector.load %arg4[%c0_14, %c0_15, %c0_16] : memref<1x2x128xf32, #tpu.memory_space<vmem>>, vector<1x2x128xf32>
    tpu.vector_store %arg4[%c0_14, %c0_15, %c0_16], %27 {strides = array<i32>} : memref<1x2x128xf32, #tpu.memory_space<vmem>>, vector<1x2x128xf32>,
    %29 = vector.shape_cast %20 : vector<16x128xf32> to vector<1x16x128xf32>
    %30 = arith.truncf %29 : vector<1x16x128xf32> to vector<1x16x128xbf16>
    %c0_17 = arith.constant 0 : index
    %c0_18 = arith.constant 0 : index
    %c0_19 = arith.constant 0 : index
    %31 = vector.load %arg3[%c0_17, %c0_18, %c0_19] : memref<1x16x128xbf16, #tpu.memory_space<vmem>>, vector<1x16x128xbf16>
    tpu.vector_store %arg3[%c0_17, %c0_18, %c0_19], %30 {strides = array<i32>} : memref<1x16x128xbf16, #tpu.memory_space<vmem>>, vector<1x16x128xbf16>,
    return
  }
  func.func @transform_0(%arg0: i32) -> (i32, i32, i32) {
    %c0_i32 = arith.constant 0 : i32
    %c0_i32_0 = arith.constant 0 : i32
    %c0_i32_1 = arith.constant 0 : i32
    return %arg0, %c0_i32, %c0_i32_0 : i32, i32, i32
  }
  func.func @transform_1(%arg0: i32) -> (i32, i32, i32) {
    %c0_i32 = arith.constant 0 : i32
    %c0_i32_0 = arith.constant 0 : i32
    %c0_i32_1 = arith.constant 0 : i32
    %c0_i32_2 = arith.constant 0 : i32
    return %c0_i32, %c0_i32_0, %c0_i32_1 : i32, i32, i32
  }
  func.func @transform_2(%arg0: i32) -> (i32, i32, i32) {
    %c0_i32 = arith.constant 0 : i32
    %c0_i32_0 = arith.constant 0 : i32
    %c0_i32_1 = arith.constant 0 : i32
    return %arg0, %c0_i32, %c0_i32_0 : i32, i32, i32
  }
  func.func @transform_3(%arg0: i32) -> (i32, i32, i32) {
    %c0_i32 = arith.constant 0 : i32
    %c0_i32_0 = arith.constant 0 : i32
    %c0_i32_1 = arith.constant 0 : i32
    return %arg0, %c0_i32, %c0_i32_0 : i32, i32, i32
  }
}

module attributes {stable_mosaic.version = 11 : i64} {
  func.func @_conv3x3_kernel(%arg0: i32, %arg1: memref<1x16x128xbf16, #tpu.memory_space<vmem>>, %arg2: memref<3x128x128xbf16, #tpu.memory_space<vmem>>, %arg3: memref<1x128xf32, #tpu.memory_space<vmem>>, %arg4: memref<1x128xf32, #tpu.memory_space<vmem>>, %arg5: memref<1x16x128xbf16, #tpu.memory_space<vmem>>, %arg6: memref<1x2x128xf32, #tpu.memory_space<vmem>>) attributes {dimension_semantics = [#tpu.dimension_semantics<parallel>], iteration_bounds = array<i64: 2>, scalar_prefetch = 0 : i64, scratch_operands = 0 : i64, tpu.core_type = #tpu.core_type<tc>, window_params = [{transform_indices = @transform_0, window_bounds = array<i64: 1, 16, 128>}, {pipeline_mode = #tpu.pipeline_mode<synchronous>, transform_indices = @transform_1, window_bounds = array<i64: 3, 128, 128>}, {pipeline_mode = #tpu.pipeline_mode<synchronous>, transform_indices = @transform_2, window_bounds = array<i64: 1, 128>}, {pipeline_mode = #tpu.pipeline_mode<synchronous>, transform_indices = @transform_3, window_bounds = array<i64: 1, 128>}, {transform_indices = @transform_4, window_bounds = array<i64: 1, 16, 128>}, {transform_indices = @transform_5, window_bounds = array<i64: 1, 2, 128>}]} {
    %c0 = arith.constant 0 : index
    %c0_0 = arith.constant 0 : index
    %c0_1 = arith.constant 0 : index
    %0 = vector.load %arg1[%c0, %c0_0, %c0_1] : memref<1x16x128xbf16, #tpu.memory_space<vmem>>, vector<1x16x128xbf16>
    %1 = vector.shape_cast %0 : vector<1x16x128xbf16> to vector<16x128xbf16>
    %2 = arith.extf %1 : vector<16x128xbf16> to vector<16x128xf32>
    %c0_2 = arith.constant 0 : index
    %c0_3 = arith.constant 0 : index
    %3 = vector.load %arg3[%c0_2, %c0_3] : memref<1x128xf32, #tpu.memory_space<vmem>>, vector<1x128xf32>
    %4 = vector.broadcast %3 : vector<1x128xf32> to vector<16x128xf32>
    %5 = arith.mulf %2, %4 : vector<16x128xf32>
    %c0_4 = arith.constant 0 : index
    %c0_5 = arith.constant 0 : index
    %6 = vector.load %arg4[%c0_4, %c0_5] : memref<1x128xf32, #tpu.memory_space<vmem>>, vector<1x128xf32>
    %7 = vector.broadcast %6 : vector<1x128xf32> to vector<16x128xf32>
    %8 = arith.addf %5, %7 : vector<16x128xf32>
    %cst = arith.constant 0.000000e+00 : f32
    %9 = vector.broadcast %cst : f32 to vector<16x128xf32>
    %10 = arith.maximumf %8, %9 : vector<16x128xf32>
    %cst_6 = arith.constant 0.000000e+00 : f32
    %11 = vector.broadcast %cst_6 : f32 to vector<1x128xf32>
    %12 = vector.extract_strided_slice %10 {offsets = [0, 0], sizes = [15, 128], strides = [1, 1]} : vector<16x128xf32> to vector<15x128xf32>
    %13 = tpu.concatenate %11, %12 in 0 : vector<1x128xf32>, vector<15x128xf32> -> vector<16x128xf32>
    %14 = vector.extract_strided_slice %10 {offsets = [1, 0], sizes = [15, 128], strides = [1, 1]} : vector<16x128xf32> to vector<15x128xf32>
    %15 = tpu.concatenate %14, %11 in 0 : vector<15x128xf32>, vector<1x128xf32> -> vector<16x128xf32>
    %16 = arith.truncf %13 : vector<16x128xf32> to vector<16x128xbf16>
    %c0_7 = arith.constant 0 : index
    %c0_8 = arith.constant 0 : index
    %c0_9 = arith.constant 0 : index
    %17 = vector.load %arg2[%c0_7, %c0_8, %c0_9] : memref<3x128x128xbf16, #tpu.memory_space<vmem>>, vector<1x128x128xbf16>
    %18 = vector.shape_cast %17 : vector<1x128x128xbf16> to vector<128x128xbf16>
    %cst_10 = arith.constant dense<0.000000e+00> : vector<16x128xf32>
    %19 = tpu.matmul %16, %18, %cst_10 {dimension_numbers = #tpu.dot_dimension_numbers<[1], [0], [0], [1], [0, 0, 1, 1], [], []>} : vector<16x128xbf16>, vector<128x128xbf16>, vector<16x128xf32> -> vector<16x128xf32>
    %20 = arith.truncf %10 : vector<16x128xf32> to vector<16x128xbf16>
    %c1 = arith.constant 1 : index
    %c0_11 = arith.constant 0 : index
    %c0_12 = arith.constant 0 : index
    %21 = vector.load %arg2[%c1, %c0_11, %c0_12] : memref<3x128x128xbf16, #tpu.memory_space<vmem>>, vector<1x128x128xbf16>
    %22 = vector.shape_cast %21 : vector<1x128x128xbf16> to vector<128x128xbf16>
    %cst_13 = arith.constant dense<0.000000e+00> : vector<16x128xf32>
    %23 = tpu.matmul %20, %22, %cst_13 {dimension_numbers = #tpu.dot_dimension_numbers<[1], [0], [0], [1], [0, 0, 1, 1], [], []>} : vector<16x128xbf16>, vector<128x128xbf16>, vector<16x128xf32> -> vector<16x128xf32>
    %24 = arith.addf %19, %23 : vector<16x128xf32>
    %25 = arith.truncf %15 : vector<16x128xf32> to vector<16x128xbf16>
    %c2 = arith.constant 2 : index
    %c0_14 = arith.constant 0 : index
    %c0_15 = arith.constant 0 : index
    %26 = vector.load %arg2[%c2, %c0_14, %c0_15] : memref<3x128x128xbf16, #tpu.memory_space<vmem>>, vector<1x128x128xbf16>
    %27 = vector.shape_cast %26 : vector<1x128x128xbf16> to vector<128x128xbf16>
    %cst_16 = arith.constant dense<0.000000e+00> : vector<16x128xf32>
    %28 = tpu.matmul %25, %27, %cst_16 {dimension_numbers = #tpu.dot_dimension_numbers<[1], [0], [0], [1], [0, 0, 1, 1], [], []>} : vector<16x128xbf16>, vector<128x128xbf16>, vector<16x128xf32> -> vector<16x128xf32>
    %29 = arith.addf %24, %28 : vector<16x128xf32>
    %cst_17 = arith.constant dense<0.000000e+00> : vector<128xf32>
    %30 = vector.multi_reduction <add>, %29, %cst_17 [0] : vector<16x128xf32> to vector<128xf32>
    %31 = vector.shape_cast %30 : vector<128xf32> to vector<1x128xf32>
    %32 = arith.mulf %29, %29 : vector<16x128xf32>
    %cst_18 = arith.constant dense<0.000000e+00> : vector<128xf32>
    %33 = vector.multi_reduction <add>, %32, %cst_18 [0] : vector<16x128xf32> to vector<128xf32>
    %34 = vector.shape_cast %33 : vector<128xf32> to vector<1x128xf32>
    %35 = tpu.concatenate %31, %34 in 0 : vector<1x128xf32>, vector<1x128xf32> -> vector<2x128xf32>
    %36 = vector.shape_cast %35 : vector<2x128xf32> to vector<1x2x128xf32>
    %c0_19 = arith.constant 0 : index
    %c0_20 = arith.constant 0 : index
    %c0_21 = arith.constant 0 : index
    %37 = vector.load %arg6[%c0_19, %c0_20, %c0_21] : memref<1x2x128xf32, #tpu.memory_space<vmem>>, vector<1x2x128xf32>
    tpu.vector_store %arg6[%c0_19, %c0_20, %c0_21], %36 {strides = array<i32>} : memref<1x2x128xf32, #tpu.memory_space<vmem>>, vector<1x2x128xf32>,
    %38 = vector.shape_cast %29 : vector<16x128xf32> to vector<1x16x128xf32>
    %39 = arith.truncf %38 : vector<1x16x128xf32> to vector<1x16x128xbf16>
    %c0_22 = arith.constant 0 : index
    %c0_23 = arith.constant 0 : index
    %c0_24 = arith.constant 0 : index
    %40 = vector.load %arg5[%c0_22, %c0_23, %c0_24] : memref<1x16x128xbf16, #tpu.memory_space<vmem>>, vector<1x16x128xbf16>
    tpu.vector_store %arg5[%c0_22, %c0_23, %c0_24], %39 {strides = array<i32>} : memref<1x16x128xbf16, #tpu.memory_space<vmem>>, vector<1x16x128xbf16>,
    return
  }
  func.func @transform_0(%arg0: i32) -> (i32, i32, i32) {
    %c0_i32 = arith.constant 0 : i32
    %c0_i32_0 = arith.constant 0 : i32
    %c0_i32_1 = arith.constant 0 : i32
    return %arg0, %c0_i32, %c0_i32_0 : i32, i32, i32
  }
  func.func @transform_1(%arg0: i32) -> (i32, i32, i32) {
    %c0_i32 = arith.constant 0 : i32
    %c0_i32_0 = arith.constant 0 : i32
    %c0_i32_1 = arith.constant 0 : i32
    %c0_i32_2 = arith.constant 0 : i32
    return %c0_i32, %c0_i32_0, %c0_i32_1 : i32, i32, i32
  }
  func.func @transform_2(%arg0: i32) -> (i32, i32) {
    %c0_i32 = arith.constant 0 : i32
    %c0_i32_0 = arith.constant 0 : i32
    %c0_i32_1 = arith.constant 0 : i32
    return %c0_i32, %c0_i32_0 : i32, i32
  }
  func.func @transform_3(%arg0: i32) -> (i32, i32) {
    %c0_i32 = arith.constant 0 : i32
    %c0_i32_0 = arith.constant 0 : i32
    %c0_i32_1 = arith.constant 0 : i32
    return %c0_i32, %c0_i32_0 : i32, i32
  }
  func.func @transform_4(%arg0: i32) -> (i32, i32, i32) {
    %c0_i32 = arith.constant 0 : i32
    %c0_i32_0 = arith.constant 0 : i32
    %c0_i32_1 = arith.constant 0 : i32
    return %arg0, %c0_i32, %c0_i32_0 : i32, i32, i32
  }
  func.func @transform_5(%arg0: i32) -> (i32, i32, i32) {
    %c0_i32 = arith.constant 0 : i32
    %c0_i32_0 = arith.constant 0 : i32
    %c0_i32_1 = arith.constant 0 : i32
    return %arg0, %c0_i32, %c0_i32_0 : i32, i32, i32
  }
}

module attributes {stable_mosaic.version = 11 : i64} {
  func.func @_bn_relu_kernel(%arg0: i32, %arg1: memref<1x16x128xbf16, #tpu.memory_space<vmem>>, %arg2: memref<1x128xf32, #tpu.memory_space<vmem>>, %arg3: memref<1x128xf32, #tpu.memory_space<vmem>>, %arg4: memref<1x16x128xf32, #tpu.memory_space<vmem>>) attributes {dimension_semantics = [#tpu.dimension_semantics<parallel>], iteration_bounds = array<i64: 2>, scalar_prefetch = 0 : i64, scratch_operands = 0 : i64, tpu.core_type = #tpu.core_type<tc>, window_params = [{transform_indices = @transform_0, window_bounds = array<i64: 1, 16, 128>}, {pipeline_mode = #tpu.pipeline_mode<synchronous>, transform_indices = @transform_1, window_bounds = array<i64: 1, 128>}, {pipeline_mode = #tpu.pipeline_mode<synchronous>, transform_indices = @transform_2, window_bounds = array<i64: 1, 128>}, {transform_indices = @transform_3, window_bounds = array<i64: 1, 16, 128>}]} {
    %c0 = arith.constant 0 : index
    %c0_0 = arith.constant 0 : index
    %c0_1 = arith.constant 0 : index
    %0 = vector.load %arg1[%c0, %c0_0, %c0_1] : memref<1x16x128xbf16, #tpu.memory_space<vmem>>, vector<1x16x128xbf16>
    %1 = arith.extf %0 : vector<1x16x128xbf16> to vector<1x16x128xf32>
    %c0_2 = arith.constant 0 : index
    %c0_3 = arith.constant 0 : index
    %2 = vector.load %arg2[%c0_2, %c0_3] : memref<1x128xf32, #tpu.memory_space<vmem>>, vector<1x128xf32>
    %3 = vector.shape_cast %2 : vector<1x128xf32> to vector<1x1x128xf32>
    %4 = vector.broadcast %3 : vector<1x1x128xf32> to vector<1x16x128xf32>
    %5 = arith.mulf %1, %4 : vector<1x16x128xf32>
    %c0_4 = arith.constant 0 : index
    %c0_5 = arith.constant 0 : index
    %6 = vector.load %arg3[%c0_4, %c0_5] : memref<1x128xf32, #tpu.memory_space<vmem>>, vector<1x128xf32>
    %7 = vector.shape_cast %6 : vector<1x128xf32> to vector<1x1x128xf32>
    %8 = vector.broadcast %7 : vector<1x1x128xf32> to vector<1x16x128xf32>
    %9 = arith.addf %5, %8 : vector<1x16x128xf32>
    %cst = arith.constant 0.000000e+00 : f32
    %10 = vector.broadcast %cst : f32 to vector<1x16x128xf32>
    %11 = arith.maximumf %9, %10 : vector<1x16x128xf32>
    %c0_6 = arith.constant 0 : index
    %c0_7 = arith.constant 0 : index
    %c0_8 = arith.constant 0 : index
    %12 = vector.load %arg4[%c0_6, %c0_7, %c0_8] : memref<1x16x128xf32, #tpu.memory_space<vmem>>, vector<1x16x128xf32>
    tpu.vector_store %arg4[%c0_6, %c0_7, %c0_8], %11 {strides = array<i32>} : memref<1x16x128xf32, #tpu.memory_space<vmem>>, vector<1x16x128xf32>,
    return
  }
  func.func @transform_0(%arg0: i32) -> (i32, i32, i32) {
    %c0_i32 = arith.constant 0 : i32
    %c0_i32_0 = arith.constant 0 : i32
    %c0_i32_1 = arith.constant 0 : i32
    return %arg0, %c0_i32, %c0_i32_0 : i32, i32, i32
  }
  func.func @transform_1(%arg0: i32) -> (i32, i32) {
    %c0_i32 = arith.constant 0 : i32
    %c0_i32_0 = arith.constant 0 : i32
    %c0_i32_1 = arith.constant 0 : i32
    return %c0_i32, %c0_i32_0 : i32, i32
  }
  func.func @transform_2(%arg0: i32) -> (i32, i32) {
    %c0_i32 = arith.constant 0 : i32
    %c0_i32_0 = arith.constant 0 : i32
    %c0_i32_1 = arith.constant 0 : i32
    return %c0_i32, %c0_i32_0 : i32, i32
  }
  func.func @transform_3(%arg0: i32) -> (i32, i32, i32) {
    %c0_i32 = arith.constant 0 : i32
    %c0_i32_0 = arith.constant 0 : i32
    %c0_i32_1 = arith.constant 0 : i32
    return %arg0, %c0_i32, %c0_i32_0 : i32, i32, i32
  }
}

</mosaic_0001>

<bundles_post_ra>
// kernel: double_conv_pallas.3
= control target key start
LH: loop header
LB: loop body
LE: loop exit
PB: predicated region body
PF: predicated region fallthrough
CT: control target
= control target key end

     0   :  { %s714_s12 = smov 0   ;;  %s784_s0 = inlined_call_operand.vmem [shape: f32[2,16,64], index: 0, kind: input, shape index: {}]   ;;  %s785_s1 = inlined_call_operand.vmem [shape: bf16[3,64,128], index: 1, kind: input, shape index: {}]   ;;  %s786_s2 = inlined_call_operand.vmem [shape: bf16[2,16,128], index: 2, kind: output, shape index: {0}]   ;;  %s787_s3 = inlined_call_operand.vmem [shape: f32[2,2,128], index: 3, kind: output, shape index: {1}]  }
   0x1 LB: > { %s551_s13 = sadd.s32 4294967295, %s690_s12   ;;  %p555_p0 = scmp.ge.s32.totalorder %s690_s12, 1  ;;  %s690_s12 = sphi %s714_s12, %s14_s12  }
   0x2   : > { %p140_p1 = scmp.lt.s32.totalorder %s690_s12, 3 }
   0x4   : > { %p141_p2 = pnand %p555_p0, %p140_p1 }
   0x5   : > { %v672_v0 = vld [vmem:[%s785_s1] sm:$0xff] (!%p141_p2)   ;;  %v692_v1 = vmov (!%p141_p2), 0.0   ;;  %v673_v2 = vld [vmem:[%s785_s1 + $0x8] sm:$0xff] (!%p141_p2)   ;;  %vm693_vm0 = vmmov (!%p141_p2), 0   ;;  %p168_p3 = scmp.lt.s32.totalorder (!%p141_p2), %s551_s13, 1  ;;  %v674_v4 = vld [vmem:[%s785_s1 + $0x10] sm:$0xff] (!%p141_p2)  }
   0x6   : > { %144 = sbr.rel (%p141_p2) target bundleno = 272 (0x110), region = 28  ;;  %632 = vmatprep.subr.bf16.mxu0 (!%p141_p2), %v692_v1  ;;  %620 = vmatprep.subr.bf16.mxu1 (!%p141_p2), %v692_v1  ;;  %v676_v3 = vld [vmem:[%s785_s1 + $0x20] sm:$0xff] (!%p141_p2)   ;;  %v678_v5 = vld [vmem:[%s785_s1 + $0x28] sm:$0xff] (!%p141_p2)   ;;  %vm187_vm1 = vcmask (!%p141_p2), 1040384   ;;  %v675_v8 = vld [vmem:[%s785_s1 + $0x18] sm:$0xff] (!%p141_p2)   ;;  %vm244_vm2 = vcmask (!%p141_p2), 523264  }
   0x7   : > { %633 = vmatpush3.bf16.msra.mxu0 (!%p141_p2), %v672_v0  ;;  %640 = vmatprep.mubr.msk.bf16.mxu0 (!%p141_p2), %vm693_vm0, %v692_v1  ;;  %v680_v11 = vld [vmem:[%s785_s1 + $0x30] sm:$0xff] (!%p141_p2)   ;;  %v677_v15 = vld [vmem:[%s785_s1 + $0x40] sm:$0xff] (!%p141_p2)   ;;  %v682_v16 = vld [vmem:[%s785_s1 + $0x38] sm:$0xff] (!%p141_p2)   ;;  %vm194_vm3 = vcmask (!%p141_p2), 1046528  }
   0x8   : > { %634 = vmatprep.subr.bf16.mxu0 (!%p141_p2), %v692_v1  ;;  %628 = vmatprep.mubr.msk.bf16.mxu1 (!%p141_p2), %vm693_vm0, %v692_v1  ;;  %v679_v18 = vld [vmem:[%s785_s1 + $0x48] sm:$0xff] (!%p141_p2)   ;;  %v681_v20 = vld [vmem:[%s785_s1 + $0x50] sm:$0xff] (!%p141_p2)   ;;  %v683_v22 = vld [vmem:[%s785_s1 + $0x58] sm:$0xff] (!%p141_p2)  }
   0x9   : > { %621 = vmatpush3.bf16.msra.mxu1 (!%p141_p2), %v676_v3 }
   0xa   : > { %622 = vmatprep.subr.bf16.mxu1 (!%p141_p2), %v692_v1 }
   0xb   : > { %635 = vmatpush3.bf16.msra.mxu0 (!%p141_p2), %v673_v2 }
   0xc   : > { %636 = vmatprep.subr.bf16.mxu0 (!%p141_p2), %v692_v1 }
   0xd   : > { %s789_s13 = smov (!%p168_p3, %s551_s13), 1  ;;  %623 = vmatpush3.bf16.msra.mxu1 %v678_v5 }
   0xe   : > { %s596_s22 = sshll.u32 %s789_s13, 4  ;;  %624 = vmatprep.subr.bf16.mxu1 %v692_v1  ;;  %s597_s17 = sshll.u32 %s789_s13, 3 }
   0xf   : > { %s172_s27 = scalar_lea.vmem %s784_s0, %s596_s22  ;;  %637 = vmatpush3.bf16.msra.mxu0 %v674_v4  ;;  %s177_s20 = scalar_lea.vmem %s786_s2, %s597_s17 }
  0x10   : > { %v183_v6 = vld [vmem:[%s172_s27] sm:$0xff]  ;;  %v184_v7 = vld [vmem:[%s172_s27 + $0x8] sm:$0xff]  ;;  %638 = vmatprep.subr.bf16.mxu0 %v692_v1  ;;  %s560_s21 = sshll.u32 %s789_s13, 1 }
  0x11   : > { %v188_v9 = vrot.slane %v183_v6, 7  ;;  %v189_v10 = vrot.slane %v184_v7, 7  ;;  %625 = vmatpush3.bf16.msra.mxu1 %v680_v11  ;;  %v210_v17 = vpack.c.bf16 %v184_v7, %v183_v6  ;;  %v195_v19 = vrot.slane %v183_v6, 1  ;;  %s181_s24 = scalar_lea.vmem %s787_s3, %s560_s21 }
  0x12   : > { %626 = vmatprep.subr.bf16.mxu1 %v692_v1  ;;  %v196_v21 = vrot.slane %v184_v7, 1 }
  0x13   : > { %v190_v12 = vsel %vm187_vm1, %v188_v9, %v189_v10  ;;  %v193_v13 = vsel %vm187_vm1, 0.0, %v188_v9  ;;  %639 = vmatpush3.bf16.msra.mxu0 %v675_v8 }
  0x14   : > { %v201_v14 = vpack.c.bf16 %v190_v12, %v193_v13  ;;  %644 = vmatprep.subr.bf16.mxu0 %v692_v1  ;;  %v197_v23 = vsel %vm194_vm3, %v195_v19, %v196_v21  ;;  %v200_v24 = vsel %vm194_vm3, %v196_v21, 0.0 }
  0x15   : > { %627 = vmatpush3.bf16.msra.mxu1 %v682_v16  ;;  %v357_v25 = vpack.c.bf16 %v200_v24, %v197_v23 }
  0x16   : > { %641 = vmatmul.mubr.msk.bf16.vlgmr.msra.gmra.mrb[0].mxu0 %vm244_vm2, %v201_v14 }
  0x17   : > { %645 = vmatpush3.bf16.msra.mxu0 %v677_v15  ;;  %652 = vmatprep.mubr.msk.bf16.mxu0 %vm693_vm0, %v692_v1 }
  0x18   : > { %646 = vmatprep.subr.bf16.mxu0 %v692_v1  ;;  %629 = vmatmul.mubr.msk.bf16.vlgmr.msra.gmra.mrb[0].mxu1 %vm244_vm2, %v210_v17 }
  0x1b   : > { %647 = vmatpush3.bf16.msra.mxu0 %v679_v18 }
  0x1c   : > { %648 = vmatprep.subr.bf16.mxu0 %v692_v1 }
  0x1f   : > { %649 = vmatpush3.bf16.msra.mxu0 %v681_v20 }
  0x20   : > { %650 = vmatprep.subr.bf16.mxu0 %v692_v1 }
  0x23   : > { %651 = vmatpush3.bf16.msra.mxu0 %v683_v22 }
  0x26   : > { %653 = vmatmul.mubr.msk.bf16.vlgmr.msra.gmra.mrb[0].mxu0 %vm244_vm2, %v357_v25 }
  0xeb   : > { %v282_v26 = vpop.f32.mrb[0].mxu1 }
  0xec   : > { %v630_v27 = vpop.f32.mrb[1].mxu1 }
  0xed   : > { %v285_v28 = vpop.f32.mrb[2].mxu1 }
  0xee   : > { %v631_v29 = vpop.f32.mrb[3].mxu1 }
  0xf9   : > { %v428_v30 = vpop.f32.mrb[0].mxu0 }
  0xfa   : > { %v656_v31 = vadd.f32 %v428_v30, %v282_v26  ;;  %v654_v32 = vpop.f32.mrb[1].mxu0 }
  0xfb   : > { %v431_v33 = vpop.f32.mrb[2].mxu0 }
  0xfc   : > { %v657_v34 = vadd.f32 %v431_v33, %v285_v28  ;;  %v655_v35 = vpop.f32.mrb[3].mxu0  ;;  %v444_v36 = vmul.f32 %v656_v31, %v656_v31 }
  0xfe   : > { %v437_v37 = vadd.f32 %v657_v34, %v656_v31  ;;  %v445_v38 = vmul.f32 %v657_v34, %v657_v34  ;;  %v603_v39 = vpack.c.bf16 %v657_v34, %v656_v31 }
 0x100   : > { %v438_v40 = vrot.slane %v437_v37, 4  ;;  %v446_v41 = vadd.f32 %v445_v38, %v444_v36  ;;  %604 = vst [vmem:[%s177_s20] sm:$0xff] %v603_v39  }
 0x102   : > { %v439_v42 = vadd.f32 %v438_v40, %v437_v37  ;;  %v447_v43 = vrot.slane %v446_v41, 4 }
 0x104   : > { %v440_v44 = vrot.slane %v439_v42, 2  ;;  %v448_v45 = vadd.f32 %v447_v43, %v446_v41 }
 0x106   : > { %v441_v46 = vadd.f32 %v440_v44, %v439_v42  ;;  %v449_v47 = vrot.slane %v448_v45, 2 }
 0x108   : > { %v442_v48 = vrot.slane %v441_v46, 1  ;;  %v450_v49 = vadd.f32 %v449_v47, %v448_v45 }
 0x10a   : > { %v451_v50 = vrot.slane %v450_v49, 1  ;;  %v443_v51 = vadd.f32 %v442_v48, %v441_v46 }
 0x10c   : > { %v452_v52 = vadd.f32 %v451_v50, %v450_v49 }
 0x10e   : > { %v453_v53 = vsel %vm187_vm1, %v443_v51, %v452_v52 }
 0x10f   : > { %454 = vst [vmem:[%s181_s24] sm:$0x3] %v453_v53 }
 0x110 PF: > { %s14_s12 = sadd.s32 1, %s690_s12  }
 0x111   : > { %p11_p4 = scmp.ge.s32.totalorder %s14_s12, 4  }
 0x113   :  { %13 = sbr.rel (!%p11_p4) target bundleno = 1 (0x1), region = 72 }

// kernel: tile.27
= control target key start
LH: loop header
LB: loop body
LE: loop exit
PB: predicated region body
PF: predicated region fallthrough
CT: control target
= control target key end

     0   :  { %s28_s0 = inlined_call_operand.vmem [shape: f32[8], index: 0, kind: input, shape index: {}]   ;;  %s29_s1 = inlined_call_operand.vmem [shape: f32[16,8], index: 1, kind: output, shape index: {}]  }
   0x1   :  { %v4_v0 = vld [vmem:[%s28_s0] ss:$0 sm:$0xff] }
   0x2   :  { %5 = vst [vmem:[%s29_s1] sm:$0xff] %v4_v0  ;;  %8 = vst [vmem:[%s29_s1 + $0x8] sm:$0xff] %v4_v0 }

// kernel: tile.29
= control target key start
LH: loop header
LB: loop body
LE: loop exit
PB: predicated region body
PF: predicated region fallthrough
CT: control target
= control target key end

     0   :  { %s131_s10 = smov 120   ;;  %s132_s11 = smov 104   ;;  %vm3_vm0 = vcmask 64512   ;;  %vm9_vm1 = vcmask 1048512   ;;  %vm15_vm2 = vcmask 982912   ;;  %vm21_vm3 = vcmask 917312   ;;  %s207_s0 = inlined_call_operand.vmem [shape: f32[16,8], index: 0, kind: input, shape index: {}]   ;;  %s208_s1 = inlined_call_operand.vmem [shape: f32[1,128], index: 1, kind: output, shape index: {}]  }
   0x1   :  { %v101_v0 = vld [vmem:[%s207_s0 + $0xf] sm:$0x1]   ;;  %v103_v1 = vld [vmem:[%s207_s0 + $0xd] sm:$0x1]   ;;  %v102_v2 = vld [vmem:[%s207_s0 + $0xe] sm:$0x1]  }
   0x2   :  { %7 = vrot.lane.b32.xlu0 %v101_v0, %s131_s10  ;;  %19 = vrot.lane.b32.xlu1 %v103_v1, %s132_s11  ;;  %v104_v3 = vld [vmem:[%s207_s0 + $0xc] sm:$0x1]   ;;  %s133_s16 = smov 112   ;;  %s134_s17 = smov 96   ;;  %v105_v4 = vld [vmem:[%s207_s0 + $0xb] sm:$0x1]  }
   0x3   :  { %v106_v5 = vld [vmem:[%s207_s0 + $0xa] sm:$0x1]   ;;  %v2_v6 = vld [vmem:[%s207_s0] sm:$0x1]   ;;  %s135_s24 = smov 88   ;;  %s136_s25 = smov 80  }
   0x4   :  { %4 = vst.msk [vmem:[#allocation0] sm:$0x1] %vm3_vm0, %v2_v6   ;;  %v107_v7 = vld [vmem:[%s207_s0 + $0x9] sm:$0x1]   ;;  %v108_v8 = vld [vmem:[%s207_s0 + $0x8] sm:$0x1]  }
   0x5   :  { %s137_s30 = smov 72   ;;  %s138_s2 = smov 64   ;;  %v109_v9 = vld [vmem:[%s207_s0 + $0x7] sm:$0x1]   ;;  %v110_v10 = vld [vmem:[%s207_s0 + $0x6] sm:$0x1]  }
   0x6   :  { %13 = vrot.lane.b32.xlu0 %v102_v2, %s133_s16  ;;  %25 = vrot.lane.b32.xlu1 %v104_v3, %s134_s17  ;;  %s139_s7 = smov 56   ;;  %s140_s8 = smov 48   ;;  %v111_v11 = vld [vmem:[%s207_s0 + $0x5] sm:$0x1]   ;;  %v112_v12 = vld [vmem:[%s207_s0 + $0x4] sm:$0x1]  }
   0x7   :  { %s141_s13 = smov 40   ;;  %s142_s14 = smov 32   ;;  %v113_v13 = vld [vmem:[%s207_s0 + $0x3] sm:$0x1]   ;;  %v114_v14 = vld [vmem:[%s207_s0 + $0x2] sm:$0x1]  }
   0x8   :  { %s143_s19 = smov 24   ;;  %s144_s20 = smov 16   ;;  %v115_v15 = vld [vmem:[%s207_s0 + $0x1] sm:$0x1]   ;;  %vm27_vm4 = vcmask 851712   ;;  %vm33_vm5 = vcmask 786112  }
   0x9   :  { %s145_s0 = smov 8   ;;  %vm39_vm6 = vcmask 720512   ;;  %vm45_vm7 = vcmask 654912   ;;  %vm51_vm8 = vcmask 589312   ;;  %vm57_vm9 = vcmask 523712  }
   0xa   :  { %31 = vrot.lane.b32.xlu0 %v105_v4, %s135_s24  ;;  %37 = vrot.lane.b32.xlu1 %v106_v5, %s136_s25  ;;  %vm63_vm10 = vcmask 458112   ;;  %vm69_vm11 = vcmask 392512   ;;  %vm75_vm12 = vcmask 326912   ;;  %vm81_vm13 = vcmask 261312  }
   0xb   :  { %vm87_vm14 = vcmask 195712   ;;  %vm93_vm15 = vcmask 130112  }
   0xe   :  { %43 = vrot.lane.b32.xlu0 %v107_v7, %s137_s30  ;;  %49 = vrot.lane.b32.xlu1 %v108_v8, %s138_s2 }
  0x12   :  { %55 = vrot.lane.b32.xlu0 %v109_v9, %s139_s7  ;;  %61 = vrot.lane.b32.xlu1 %v110_v10, %s140_s8 }
  0x16   :  { %67 = vrot.lane.b32.xlu0 %v111_v11, %s141_s13  ;;  %73 = vrot.lane.b32.xlu1 %v112_v12, %s142_s14 }
  0x1a   :  { %79 = vrot.lane.b32.xlu0 %v113_v13, %s143_s19  ;;  %85 = vrot.lane.b32.xlu1 %v114_v14, %s144_s20 }
  0x1e   :  { %91 = vrot.lane.b32.xlu0 %v115_v15, %s145_s0 }
  0x74   :  { %v8_v16 = vpop.permute.xlu0 %7   ;;  %v20_v17 = vpop.permute.xlu1 %19  }
  0x75   :  { %10 = vst.msk [vmem:[#allocation0] sm:$0x1] %vm9_vm1, %v8_v16  }
  0x78   :  { %v14_v18 = vpop.permute.xlu0 %13   ;;  %v26_v19 = vpop.permute.xlu1 %25  }
  0x79   :  { %16 = vst.msk [vmem:[#allocation0] sm:$0x1] %vm15_vm2, %v14_v18  }
  0x7a   :  { %22 = vst.msk [vmem:[#allocation0] sm:$0x1] %vm21_vm3, %v20_v17  }
  0x7b   :  { %28 = vst.msk [vmem:[#allocation0] sm:$0x1] %vm27_vm4, %v26_v19  }
  0x7c   :  { %v32_v20 = vpop.permute.xlu0 %31   ;;  %v38_v21 = vpop.permute.xlu1 %37  }
  0x7d   :  { %34 = vst.msk [vmem:[#allocation0] sm:$0x1] %vm33_vm5, %v32_v20  }
  0x7e   :  { %40 = vst.msk [vmem:[#allocation0] sm:$0x1] %vm39_vm6, %v38_v21  }
  0x80   :  { %v44_v22 = vpop.permute.xlu0 %43   ;;  %v50_v23 = vpop.permute.xlu1 %49  }
  0x81   :  { %46 = vst.msk [vmem:[#allocation0] sm:$0x1] %vm45_vm7, %v44_v22  }
  0x82   :  { %52 = vst.msk [vmem:[#allocation0] sm:$0x1] %vm51_vm8, %v50_v23  }
  0x84   :  { %v56_v24 = vpop.permute.xlu0 %55   ;;  %v62_v25 = vpop.permute.xlu1 %61  }
  0x85   :  { %58 = vst.msk [vmem:[#allocation0] sm:$0x1] %vm57_vm9, %v56_v24  }
  0x86   :  { %64 = vst.msk [vmem:[#allocation0] sm:$0x1] %vm63_vm10, %v62_v25  }
  0x88   :  { %v68_v26 = vpop.permute.xlu0 %67   ;;  %v74_v27 = vpop.permute.xlu1 %73  }
  0x89   :  { %70 = vst.msk [vmem:[#allocation0] sm:$0x1] %vm69_vm11, %v68_v26  }
  0x8a   :  { %76 = vst.msk [vmem:[#allocation0] sm:$0x1] %vm75_vm12, %v74_v27  }
  0x8c   :  { %v80_v28 = vpop.permute.xlu0 %79   ;;  %v86_v29 = vpop.permute.xlu1 %85  }
  0x8d   :  { %82 = vst.msk [vmem:[#allocation0] sm:$0x1] %vm81_vm13, %v80_v28  }
  0x8e   :  { %88 = vst.msk [vmem:[#allocation0] sm:$0x1] %vm87_vm14, %v86_v29  }
  0x90   :  { %v92_v30 = vpop.permute.xlu0 %91  }
  0x91   :  { %94 = vst.msk [vmem:[#allocation0] sm:$0x1] %vm93_vm15, %v92_v30  }
  0x98   :  { %v98_v31 = vld [vmem:[#allocation0] sm:$0x1] }
  0x99   :  { %100 = vst [vmem:[%s208_s1] sm:$0x1] %v98_v31 }

// kernel: double_conv_pallas.4
= control target key start
LH: loop header
LB: loop body
LE: loop exit
PB: predicated region body
PF: predicated region fallthrough
CT: control target
= control target key end

     0   :  { %s974_s18 = smov 0   ;;  %s1125_s0 = inlined_call_operand.vmem [shape: bf16[2,16,128], index: 0, kind: input, shape index: {}]   ;;  %s1126_s1 = inlined_call_operand.vmem [shape: bf16[3,128,128], index: 1, kind: input, shape index: {}]   ;;  %s1127_s2 = inlined_call_operand.vmem [shape: f32[1,128], index: 2, kind: input, shape index: {}]   ;;  %s1128_s3 = inlined_call_operand.vmem [shape: f32[1,128], index: 3, kind: input, shape index: {}]   ;;  %s1129_s4 = inlined_call_operand.vmem [shape: bf16[2,16,128], index: 4, kind: output, shape index: {0}]   ;;  %s1130_s5 = inlined_call_operand.vmem [shape: f32[2,2,128], index: 5, kind: output, shape index: {1}]  }
   0x1 LB: > { %s713_s19 = sadd.s32 4294967295, %s939_s18   ;;  %p717_p0 = scmp.ge.s32.totalorder %s939_s18, 1  ;;  %s939_s18 = sphi %s974_s18, %s16_s18  }
   0x2   : > { %p190_p1 = scmp.lt.s32.totalorder %s939_s18, 3 }
   0x4   : > { %p191_p2 = pnand %p717_p0, %p190_p1 }
   0x5   : > { %v909_v0 = vld [vmem:[%s1126_s1] sm:$0xff] (!%p191_p2)   ;;  %v941_v1 = vmov (!%p191_p2), 0.0   ;;  %v910_v2 = vld [vmem:[%s1126_s1 + $0x8] sm:$0xff] (!%p191_p2)   ;;  %vm942_vm0 = vmmov (!%p191_p2), 0   ;;  %p222_p3 = scmp.lt.s32.totalorder (!%p191_p2), %s713_s19, 1  ;;  %v911_v3 = vld [vmem:[%s1126_s1 + $0x10] sm:$0xff] (!%p191_p2)  }
   0x6   : > { %194 = sbr.rel (%p191_p2) target bundleno = 304 (0x130), region = 36  ;;  %852 = vmatprep.subr.bf16.mxu0 (!%p191_p2), %v941_v1  ;;  %832 = vmatprep.subr.bf16.mxu1 (!%p191_p2), %v941_v1  ;;  %v917_v4 = vld [vmem:[%s1126_s1 + $0x40] sm:$0xff] (!%p191_p2)   ;;  %v912_v7 = vld [vmem:[%s1126_s1 + $0x18] sm:$0xff] (!%p191_p2)   ;;  %v919_v13 = vld [vmem:[%s1126_s1 + $0x48] sm:$0xff] (!%p191_p2)   ;;  %vm263_vm1 = vcmask (!%p191_p2), 1040384   ;;  %vm943_vm3 = vmmov (!%p191_p2), 1  }
   0x7   : > { %853 = vmatpush3.bf16.msra.mxu0 (!%p191_p2), %v909_v0  ;;  %868 = vmatprep.mubr.msk.bf16.mxu0 (!%p191_p2), %vm942_vm0, %v941_v1  ;;  %v723_v6 = vld [vmem:[%s1127_s2] ss:$0 sm:$0xff] (!%p191_p2)  ;;  %v921_v17 = vld [vmem:[%s1126_s1 + $0x50] sm:$0xff] (!%p191_p2)   ;;  %v914_v19 = vld [vmem:[%s1126_s1 + $0x28] sm:$0xff] (!%p191_p2)   ;;  %vm270_vm5 = vcmask (!%p191_p2), 1046528  }
   0x8   : > { %854 = vmatprep.subr.bf16.mxu0 (!%p191_p2), %v941_v1  ;;  %848 = vmatprep.mubr.msk.bf16.mxu1 (!%p191_p2), %vm942_vm0, %v941_v1  ;;  %v724_v10 = vld [vmem:[%s1128_s3] ss:$0 sm:$0xff] (!%p191_p2)  ;;  %v923_v21 = vld [vmem:[%s1126_s1 + $0x58] sm:$0xff] (!%p191_p2)   ;;  %v915_v22 = vld [vmem:[%s1126_s1 + $0x30] sm:$0xff] (!%p191_p2)  }
   0x9   : > { %833 = vmatpush3.bf16.msra.mxu1 (!%p191_p2), %v917_v4  ;;  %v913_v14 = vld [vmem:[%s1126_s1 + $0x20] sm:$0xff] (!%p191_p2)   ;;  %v916_v26 = vld [vmem:[%s1126_s1 + $0x38] sm:$0xff] (!%p191_p2)   ;;  %v927_v28 = vld [vmem:[%s1126_s1 + $0x68] sm:$0xff] (!%p191_p2)  }
   0xa   : > { %834 = vmatprep.subr.bf16.mxu1 (!%p191_p2), %v941_v1  ;;  %v925_v25 = vld [vmem:[%s1126_s1 + $0x60] sm:$0xff] (!%p191_p2)   ;;  %vm757_vm2 = vmneg (!%p191_p2), %vm263_vm1  ;;  %v929_v31 = vld [vmem:[%s1126_s1 + $0x70] sm:$0xff] (!%p191_p2)  }
   0xb   : > { %855 = vmatpush3.bf16.msra.mxu0 (!%p191_p2), %v910_v2  ;;  %vm758_vm4 = vmpackc.low (!%p191_p2), %vm943_vm3, %vm757_vm2  ;;  %v918_v30 = vld [vmem:[%s1126_s1 + $0x80] sm:$0xff] (!%p191_p2)   ;;  %v920_v32 = vld [vmem:[%s1126_s1 + $0x88] sm:$0xff] (!%p191_p2)  }
   0xc   : > { %856 = vmatprep.subr.bf16.mxu0 (!%p191_p2), %v941_v1  ;;  %v931_v33 = vld [vmem:[%s1126_s1 + $0x78] sm:$0xff] (!%p191_p2)   ;;  %v922_v35 = vld [vmem:[%s1126_s1 + $0x90] sm:$0xff] (!%p191_p2)   ;;  %v926_v37 = vld [vmem:[%s1126_s1 + $0xa0] sm:$0xff] (!%p191_p2)  }
   0xd   : > { %s1132_s19 = smov (!%p222_p3, %s713_s19), 1  ;;  %835 = vmatpush3.bf16.msra.mxu1 %v919_v13  ;;  %v924_v36 = vld [vmem:[%s1126_s1 + $0x98] sm:$0xff]   ;;  %v928_v38 = vld [vmem:[%s1126_s1 + $0xa8] sm:$0xff]   ;;  %v930_v41 = vld [vmem:[%s1126_s1 + $0xb0] sm:$0xff]  }
   0xe   : > { %s792_s26 = sshll.u32 %s1132_s19, 3  ;;  %836 = vmatprep.subr.bf16.mxu1 %v941_v1  ;;  %v932_v43 = vld [vmem:[%s1126_s1 + $0xb8] sm:$0xff]   ;;  %vm785_vm6 = vmpackc.low %vm270_vm5, %vm943_vm3  ;;  %s722_s10 = sshll.u32 %s1132_s19, 1 }
   0xf   : > { %s226_s29 = scalar_lea.vmem %s1125_s0, %s792_s26  ;;  %857 = vmatpush3.bf16.msra.mxu0 %v911_v3  ;;  %s231_s9 = scalar_lea.vmem %s1129_s4, %s792_s26 }
  0x10   : > { %v797_v5 = vld [vmem:[%s226_s29] sm:$0xff]   ;;  %858 = vmatprep.subr.bf16.mxu0 %v941_v1  ;;  %s235_s12 = scalar_lea.vmem %s1130_s5, %s722_s10 }
  0x11   : > { %v798_v8 = vunpack.c.l.bf16 %v797_v5  ;;  %v799_v9 = vunpack.c.h.bf16 %v797_v5  ;;  %837 = vmatpush3.bf16.msra.mxu1 %v921_v17 }
  0x12   : > { %838 = vmatprep.subr.bf16.mxu1 %v941_v1 }
  0x13   : > { %v248_v11 = vmul.f32 %v798_v8, %v723_v6  ;;  %v249_v12 = vmul.f32 %v799_v9, %v723_v6  ;;  %859 = vmatpush3.bf16.msra.mxu0 %v912_v7 }
  0x14   : > { %860 = vmatprep.subr.bf16.mxu0 %v941_v1 }
  0x15   : > { %v257_v15 = vadd.f32 %v724_v10, %v248_v11  ;;  %v258_v16 = vadd.f32 %v724_v10, %v249_v12  ;;  %839 = vmatpush3.bf16.msra.mxu1 %v923_v21 }
  0x16   : > { %840 = vmatprep.subr.bf16.mxu1 %v941_v1 }
  0x17   : > { %v1032_v18 = vmax.f32 %v257_v15, 0.0  ;;  %861 = vmatpush3.bf16.msra.mxu0 %v913_v14  ;;  %v1037_v20 = vmax.f32 %v258_v16, 0.0 }
  0x18   : > { %862 = vmatprep.subr.bf16.mxu0 %v941_v1 }
  0x19   : > { %v264_v23 = vrot.slane %v1032_v18, 7  ;;  %v265_v24 = vrot.slane %v1037_v20, 7  ;;  %841 = vmatpush3.bf16.msra.mxu1 %v925_v25  ;;  %v294_v34 = vpack.c.bf16 %v1037_v20, %v1032_v18  ;;  %v271_v39 = vrot.slane %v1032_v18, 1 }
  0x1a   : > { %842 = vmatprep.subr.bf16.mxu1 %v941_v1  ;;  %v272_v40 = vrot.slane %v1037_v20, 1 }
  0x1b   : > { %863 = vmatpush3.bf16.msra.mxu0 %v914_v19  ;;  %v266_v27 = vsel %vm263_vm1, %v264_v23, %v265_v24 }
  0x1c   : > { %864 = vmatprep.subr.bf16.mxu0 %v941_v1  ;;  %v759_v29 = vpack.c.bf16 %v266_v27, %v264_v23  ;;  %v273_v42 = vsel %vm270_vm5, %v271_v39, %v272_v40 }
  0x1d   : > { %843 = vmatpush3.bf16.msra.mxu1 %v927_v28  ;;  %v786_v44 = vpack.c.bf16 %v272_v40, %v273_v42 }
  0x1e   : > { %844 = vmatprep.subr.bf16.mxu1 %v941_v1 }
  0x1f   : > { %865 = vmatpush3.bf16.msra.mxu0 %v915_v22 }
  0x20   : > { %866 = vmatprep.subr.bf16.mxu0 %v941_v1 }
  0x21   : > { %845 = vmatpush3.bf16.msra.mxu1 %v929_v31 }
  0x22   : > { %846 = vmatprep.subr.bf16.mxu1 %v941_v1 }
  0x23   : > { %867 = vmatpush3.bf16.msra.mxu0 %v916_v26 }
  0x24   : > { %872 = vmatprep.subr.bf16.mxu0 %v941_v1 }
  0x25   : > { %847 = vmatpush3.bf16.msra.mxu1 %v931_v33 }
  0x26   : > { %869 = vmatmul.mubr.msk.bf16.vlgmr.msra.gmra.mrb[0].mxu0 %vm758_vm4, %v759_v29 }
  0x27   : > { %873 = vmatpush3.bf16.msra.mxu0 %v918_v30  ;;  %888 = vmatprep.mubr.msk.bf16.mxu0 %vm942_vm0, %v941_v1 }
  0x28   : > { %874 = vmatprep.subr.bf16.mxu0 %v941_v1  ;;  %849 = vmatmul.mubr.bf16.vlgmr.msra.gmra.mrb[0].mxu1 %v294_v34 }
  0x2b   : > { %875 = vmatpush3.bf16.msra.mxu0 %v920_v32 }
  0x2c   : > { %876 = vmatprep.subr.bf16.mxu0 %v941_v1 }
  0x2f   : > { %877 = vmatpush3.bf16.msra.mxu0 %v922_v35 }
  0x30   : > { %878 = vmatprep.subr.bf16.mxu0 %v941_v1 }
  0x33   : > { %879 = vmatpush3.bf16.msra.mxu0 %v924_v36 }
  0x34   : > { %880 = vmatprep.subr.bf16.mxu0 %v941_v1 }
  0x37   : > { %881 = vmatpush3.bf16.msra.mxu0 %v926_v37 }
  0x38   : > { %882 = vmatprep.subr.bf16.mxu0 %v941_v1 }
  0x3b   : > { %883 = vmatpush3.bf16.msra.mxu0 %v928_v38 }
  0x3c   : > { %884 = vmatprep.subr.bf16.mxu0 %v941_v1 }
  0x3f   : > { %885 = vmatpush3.bf16.msra.mxu0 %v930_v41 }
  0x40   : > { %886 = vmatprep.subr.bf16.mxu0 %v941_v1 }
  0x43   : > { %887 = vmatpush3.bf16.msra.mxu0 %v932_v43 }
  0x46   : > { %889 = vmatmul.mubr.msk.bf16.vlgmr.msra.gmra.mrb[0].mxu0 %vm785_vm6, %v786_v44 }
  0xfb   : > { %v394_v45 = vpop.f32.mrb[0].mxu1 }
  0xfc   : > { %v850_v46 = vpop.f32.mrb[1].mxu1 }
  0xfd   : > { %v397_v47 = vpop.f32.mrb[2].mxu1 }
  0xfe   : > { %v851_v48 = vpop.f32.mrb[3].mxu1 }
 0x119   : > { %v590_v49 = vpop.f32.mrb[0].mxu0 }
 0x11a   : > { %v892_v50 = vadd.f32 %v590_v49, %v394_v45  ;;  %v890_v51 = vpop.f32.mrb[1].mxu0 }
 0x11b   : > { %v593_v52 = vpop.f32.mrb[2].mxu0 }
 0x11c   : > { %v893_v53 = vadd.f32 %v593_v52, %v397_v47  ;;  %v891_v54 = vpop.f32.mrb[3].mxu0  ;;  %v606_v55 = vmul.f32 %v892_v50, %v892_v50 }
 0x11e   : > { %v599_v56 = vadd.f32 %v893_v53, %v892_v50  ;;  %v607_v57 = vmul.f32 %v893_v53, %v893_v53  ;;  %v803_v58 = vpack.c.bf16 %v893_v53, %v892_v50 }
 0x120   : > { %v600_v59 = vrot.slane %v599_v56, 4  ;;  %v608_v60 = vadd.f32 %v607_v57, %v606_v55  ;;  %804 = vst [vmem:[%s231_s9] sm:$0xff] %v803_v58  }
 0x122   : > { %v601_v61 = vadd.f32 %v600_v59, %v599_v56  ;;  %v609_v62 = vrot.slane %v608_v60, 4 }
 0x124   : > { %v602_v63 = vrot.slane %v601_v61, 2  ;;  %v610_v0 = vadd.f32 %v609_v62, %v608_v60 }
 0x126   : > { %v603_v1 = vadd.f32 %v602_v63, %v601_v61  ;;  %v611_v2 = vrot.slane %v610_v0, 2 }
 0x128   : > { %v604_v3 = vrot.slane %v603_v1, 1  ;;  %v612_v4 = vadd.f32 %v611_v2, %v610_v0 }
 0x12a   : > { %v613_v5 = vrot.slane %v612_v4, 1  ;;  %v605_v6 = vadd.f32 %v604_v3, %v603_v1 }
 0x12c   : > { %v614_v7 = vadd.f32 %v613_v5, %v612_v4 }
 0x12e   : > { %v615_v8 = vsel %vm263_vm1, %v605_v6, %v614_v7 }
 0x12f   : > { %616 = vst [vmem:[%s235_s12] sm:$0x3] %v615_v8 }
 0x130 PF: > { %s16_s18 = sadd.s32 1, %s939_s18  }
 0x131   : > { %p13_p4 = scmp.ge.s32.totalorder %s16_s18, 4  }
 0x133   :  { %15 = sbr.rel (!%p13_p4) target bundleno = 1 (0x1), region = 80 }

// kernel: double_conv_pallas.5
= control target key start
LH: loop header
LB: loop body
LE: loop exit
PB: predicated region body
PF: predicated region fallthrough
CT: control target
= control target key end

     0   :  { %s307_s12 = smov 0   ;;  %s324_s0 = inlined_call_operand.vmem [shape: bf16[2,16,128], index: 0, kind: input, shape index: {}]   ;;  %s325_s1 = inlined_call_operand.vmem [shape: f32[1,128], index: 1, kind: input, shape index: {}]   ;;  %s326_s2 = inlined_call_operand.vmem [shape: f32[1,128], index: 2, kind: input, shape index: {}]   ;;  %s327_s3 = inlined_call_operand.vmem [shape: f32[2,16,128], index: 3, kind: output, shape index: {}]  }
   0x1 LB: > { %s252_s13 = sadd.s32 4294967295, %s285_s12   ;;  %p256_p0 = scmp.ge.s32.totalorder %s285_s12, 1  ;;  %s285_s12 = sphi %s307_s12, %s13_s12  }
   0x2   : > { %p137_p1 = scmp.lt.s32.totalorder %s285_s12, 3 }
   0x4   : > { %p138_p2 = pnand %p256_p0, %p137_p1 }
   0x5   : > { %p161_p3 = scmp.lt.s32.totalorder (!%p138_p2), %s252_s13, 1  ;;  %v261_v1 = vld [vmem:[%s325_s1] ss:$0 sm:$0xff] (!%p138_p2) }
   0x6   : > { %141 = sbr.rel (%p138_p2) target bundleno = 26 (0x1a), region = 32  ;;  %v262_v4 = vld [vmem:[%s326_s2] ss:$0 sm:$0xff] (!%p138_p2) }
   0xd   : > { %s329_s13 = smov (!%p161_p3, %s252_s13), 1 }
   0xe   : > { %s265_s14 = sshll.u32 %s329_s13, 3  ;;  %s266_s22 = sshll.u32 %s329_s13, 4 }
   0xf   : > { %s165_s17 = scalar_lea.vmem %s324_s0, %s265_s14  ;;  %s170_s25 = scalar_lea.vmem %s327_s3, %s266_s22 }
  0x10   : > { %v268_v0 = vld [vmem:[%s165_s17] sm:$0xff]  }
  0x11   : > { %v269_v2 = vunpack.c.l.bf16 %v268_v0  ;;  %v270_v3 = vunpack.c.h.bf16 %v268_v0 }
  0x13   : > { %v182_v5 = vmul.f32 %v269_v2, %v261_v1  ;;  %v183_v6 = vmul.f32 %v270_v3, %v261_v1 }
  0x15   : > { %v191_v7 = vadd.f32 %v262_v4, %v182_v5  ;;  %v192_v8 = vadd.f32 %v262_v4, %v183_v6 }
  0x17   : > { %v193_v9 = vmax.f32 %v191_v7, 0.0  ;;  %v194_v10 = vmax.f32 %v192_v8, 0.0 }
  0x19   : > { %195 = vst [vmem:[%s170_s25] sm:$0xff] %v193_v9  ;;  %196 = vst [vmem:[%s170_s25 + $0x8] sm:$0xff] %v194_v10 }
  0x1a PF: > { %s13_s12 = sadd.s32 1, %s285_s12  }
  0x1b   : > { %p10_p4 = scmp.ge.s32.totalorder %s13_s12, 4  }
  0x1d   :  { %12 = sbr.rel (!%p10_p4) target bundleno = 1 (0x1), region = 62 }

</bundles_post_ra>
